<compile_context>
chip_gen: v6e
topology: v6e:2x2x1
jax: 0.10.0
libtpu: 0.0.40
codegen_flags: <defaults>
</compile_context>

<pallas_src>
import jax
import jax.numpy as jnp
from jax.experimental import pallas as pl
from jax.experimental.pallas import tpu as pltpu


# ------------------------------ Pallas kernel --------------------------------

_SQRT_2_OVER_PI = 0.7978845608028654  # sqrt(2/pi), hoisted compile-time constant


def gelu_kernel(x_ref, o_ref):
    x = x_ref[...]
    c = jnp.asarray(_SQRT_2_OVER_PI, dtype=x.dtype)
    inner = c * (x + 0.044715 * (x * x * x))
    o_ref[...] = 0.5 * x * (1.0 + jnp.tanh(inner))   # tanh -> EUP slot


# ------------------------------ wrapper ---------------------------------------

def gelu_pallas(x, *, vmem_block_bytes=4 * 1024 * 1024):
    """Elementwise GELU via Pallas. Works for any shape; elementwise semantics
    let us flatten to a lane-dense 2D layout, pad to (8, 128) tile boundaries,
    and slice the padding back off afterwards."""
    orig_shape = x.shape
    dtype = x.dtype

    if x.ndim == 0:
        x2 = x.reshape(1, 1)
    else:
        x2 = x.reshape(-1, orig_shape[-1])
    M, D = x2.shape

    # Lane-dense padding: last dim -> multiple of 128, rows -> multiple of 8.
    D_pad = max(128, ((D + 127) // 128) * 128)

    # Row-tile size: as large as fits a few MiB of VMEM (double-buffered by
    # BlockSpec), rounded to a multiple of 8 sublanes.
    bytes_per_row = D_pad * jnp.dtype(dtype).itemsize
    max_rows = max(8, (vmem_block_bytes // max(1, bytes_per_row)) // 8 * 8)
    tm = min(((M + 7) // 8) * 8, max_rows)
    tm = max(tm, 8)

    M_pad = ((M + tm - 1) // tm) * tm
    if (M_pad, D_pad) != (M, D):
        x2 = jnp.pad(x2, ((0, M_pad - M), (0, D_pad - D)))

    out = pl.pallas_call(
        gelu_kernel,
        out_shape=jax.ShapeDtypeStruct((M_pad, D_pad), dtype),
        grid=(M_pad // tm,),
        in_specs=[pl.BlockSpec((tm, D_pad), lambda i: (i, 0))],
        out_specs=pl.BlockSpec((tm, D_pad), lambda i: (i, 0)),
        compiler_params=pltpu.CompilerParams(
            dimension_semantics=("parallel",)),
    )(x2)

    out = out[:M, :D]
    return out.reshape(orig_shape)


# ------------------------------ reference -------------------------------------

def gelu_ref(x):
    c = jnp.asarray(_SQRT_2_OVER_PI, dtype=x.dtype)
    return 0.5 * x * (1.0 + jnp.tanh(c * (x + 0.044715 * x * x * x)))


# ------------------------------ main -------------------------------------------

if __name__ == "__main__":
    key = jax.random.PRNGKey(0)
    # (batch=2, seq=8, hidden=256): hidden is a multiple of 128 -> lane-dense.
    x = jax.random.normal(key, (2, 8, 256), dtype=jnp.float32)

    y = gelu_pallas(x)
    y = jax.block_until_ready(y)

    y_ref = gelu_ref(x)
    assert y.shape == x.shape
    assert bool(jnp.all(jnp.isfinite(y)))
    assert bool(jnp.allclose(y, y_ref, atol=1e-6, rtol=1e-6))
    print("KERNEL_OK")
</pallas_src>

<mosaic_0001>
module attributes {stable_mosaic.version = 11 : i64} {
  func.func @gelu_kernel(%arg0: i32, %arg1: memref<16x256xf32, #tpu.memory_space<vmem>>, %arg2: memref<16x256xf32, #tpu.memory_space<vmem>>) attributes {dimension_semantics = [#tpu.dimension_semantics<parallel>], iteration_bounds = array<i64: 1>, scalar_prefetch = 0 : i64, scratch_operands = 0 : i64, tpu.core_type = #tpu.core_type<tc>, window_params = [{transform_indices = @transform_0, window_bounds = array<i64: 16, 256>}, {transform_indices = @transform_1, window_bounds = array<i64: 16, 256>}]} {
    %c0 = arith.constant 0 : index
    %c0_0 = arith.constant 0 : index
    %0 = vector.load %arg1[%c0, %c0_0] : memref<16x256xf32, #tpu.memory_space<vmem>>, vector<16x256xf32>
    %1 = arith.mulf %0, %0 : vector<16x256xf32>
    %2 = arith.mulf %1, %0 : vector<16x256xf32>
    %cst = arith.constant 4.471500e-02 : f32
    %3 = vector.broadcast %cst : f32 to vector<16x256xf32>
    %4 = arith.mulf %3, %2 : vector<16x256xf32>
    %5 = arith.addf %0, %4 : vector<16x256xf32>
    %cst_1 = arith.constant 0.797884583 : f32
    %6 = vector.broadcast %cst_1 : f32 to vector<16x256xf32>
    %7 = arith.mulf %6, %5 : vector<16x256xf32>
    %cst_2 = arith.constant 5.000000e-01 : f32
    %8 = vector.broadcast %cst_2 : f32 to vector<16x256xf32>
    %9 = arith.mulf %8, %0 : vector<16x256xf32>
    %10 = math.tanh %7 : vector<16x256xf32>
    %cst_3 = arith.constant 1.000000e+00 : f32
    %11 = vector.broadcast %cst_3 : f32 to vector<16x256xf32>
    %12 = arith.addf %11, %10 : vector<16x256xf32>
    %13 = arith.mulf %9, %12 : vector<16x256xf32>
    %c0_4 = arith.constant 0 : index
    %c0_5 = arith.constant 0 : index
    %14 = vector.load %arg2[%c0_4, %c0_5] : memref<16x256xf32, #tpu.memory_space<vmem>>, vector<16x256xf32>
    tpu.vector_store %arg2[%c0_4, %c0_5], %13 {strides = array<i32>} : memref<16x256xf32, #tpu.memory_space<vmem>>, vector<16x256xf32>,
    return
  }
  func.func @transform_0(%arg0: i32) -> (i32, i32) {
    %c0_i32 = arith.constant 0 : i32
    %c0_i32_0 = arith.constant 0 : i32
    return %arg0, %c0_i32 : i32, i32
  }
  func.func @transform_1(%arg0: i32) -> (i32, i32) {
    %c0_i32 = arith.constant 0 : i32
    %c0_i32_0 = arith.constant 0 : i32
    return %arg0, %c0_i32 : i32, i32
  }
}

</mosaic_0001>

<bundles_post_ra>
// kernel: tpu_custom_call.1
= control target key start
LH: loop header
LB: loop body
LE: loop exit
PB: predicated region body
PF: predicated region fallthrough
CT: control target
= control target key end

     0   :  { %6 = vsyncpa [#allocation3], 0  ;;  %s166_s0 = inlined_call_operand.hbm [shape: f32[16,256], index: 0, kind: input, shape index: {}]   ;;  %s167_s1 = inlined_call_operand.hbm [shape: f32[16,256], index: 1, kind: output, shape index: {}]  }
   0x1   :  { %7 = vsyncpa [#allocation4], 0  ;;  %s140_s6 = smov [#allocation2]  }
   0x2   :  { %s13_s7 = sshll.u32 %s140_s6, 4  ;;  %s14_s7 = int_to_ptr.vmem [resolvable:$true] %s13_s7 }
   0x3   :  { %s104_s8 = scalar_lea.vmem %s14_s7, 512  ;;  %p109_p1 = scmp.lt.s32.totalorder %s14_s7, %s14_s7 }
   0x4   :  { %p105_p0 = scmp.ne.s32.totalorder %s14_s7, %s104_s8  ;;  %p110_p2 = scmp.lt.s32.totalorder %s104_s8, %s104_s8 }
   0x6   :  { %p111_p3 = por %p110_p2, %p109_p1 }
   0x8   :  { %p112_p4 = pnand %p111_p3, %p105_p0 }
   0xa   :  { %115 = shalt.err (!%p112_p4)
}
   0xb   :  { %s141_s9 = smov 256   ;;  %s142_s10 = smov 16  }
   0xc   :  { %19 = dma.hbm_to_vmem [thread:$0]  %s166_s0, 512, %s14_s7, [#allocation3], %s141_s9, %s141_s9, %s142_s10  }
   0xd   :  { %136 = dma.done.wait [#allocation3], 512  }
   0xe   :  { %137 = vsyncadd [#allocation3], 4294966784  ;;  %v23_v0 = vld [vmem:[#allocation2] sm:$0xff]  ;;  %v24_v1 = vld [vmem:[#allocation2 + $0x8] sm:$0xff]  ;;  %s143_s0 = smov [#allocation5]  }
   0xf   :  { %v25_v2 = vld [vmem:[#allocation2 + $0x10] sm:$0xff]  ;;  %v27_v3 = vmul.f32 %v23_v0, %v23_v0  ;;  %v28_v4 = vmul.f32 %v24_v1, %v24_v1  ;;  %v26_v5 = vld [vmem:[#allocation2 + $0x18] sm:$0xff]  ;;  %v47_v24 = vmul.f32 0.5, %v23_v0  ;;  %v48_v26 = vmul.f32 0.5, %v24_v1  ;;  %s72_s13 = sshll.u32 %s143_s0, 4  ;;  %s73_s13 = int_to_ptr.vmem [resolvable:$true] %s72_s13 }
  0x10   :  { %v29_v6 = vmul.f32 %v25_v2, %v25_v2  ;;  %v30_v7 = vmul.f32 %v26_v5, %v26_v5  ;;  %v49_v29 = vmul.f32 0.5, %v25_v2  ;;  %v50_v32 = vmul.f32 0.5, %v26_v5  ;;  %s116_s14 = scalar_lea.vmem %s73_s13, 512  ;;  %p121_p6 = scmp.lt.s32.totalorder %s73_s13, %s73_s13 }
  0x11   :  { %v31_v8 = vmul.f32 %v27_v3, %v23_v0  ;;  %v32_v9 = vmul.f32 %v28_v4, %v24_v1  ;;  %p117_p5 = scmp.ne.s32.totalorder %s73_s13, %s116_s14  ;;  %p122_p7 = scmp.lt.s32.totalorder %s116_s14, %s116_s14 }
  0x12   :  { %v33_v10 = vmul.f32 %v29_v6, %v25_v2  ;;  %v34_v11 = vmul.f32 %v30_v7, %v26_v5 }
  0x13   :  { %v35_v12 = vmul.f32 0.044715, %v31_v8  ;;  %v36_v13 = vmul.f32 0.044715, %v32_v9  ;;  %p123_p8 = por %p122_p7, %p121_p6 }
  0x14   :  { %v37_v14 = vmul.f32 0.044715, %v33_v10  ;;  %v38_v15 = vmul.f32 0.044715, %v34_v11 }
  0x15   :  { %v39_v16 = vadd.f32 %v35_v12, %v23_v0  ;;  %v40_v17 = vadd.f32 %v36_v13, %v24_v1  ;;  %p124_p9 = pnand %p123_p8, %p117_p5 }
  0x16   :  { %v41_v18 = vadd.f32 %v37_v14, %v25_v2  ;;  %v42_v19 = vadd.f32 %v38_v15, %v26_v5 }
  0x17   :  { %v43_v20 = vmul.f32 0.7978846, %v39_v16  ;;  %v44_v21 = vmul.f32 0.7978846, %v40_v17 }
  0x18   :  { %v45_v22 = vmul.f32 0.7978846, %v41_v18  ;;  %v46_v23 = vmul.f32 0.7978846, %v42_v19 }
  0x19   :  { %88 = vtanh.f32 %v43_v20 }
  0x1a   :  { %90 = vtanh.f32 %v44_v21 }
  0x1b   :  { %92 = vtanh.f32 %v45_v22 }
  0x1c   :  { %94 = vtanh.f32 %v46_v23 }
  0x26   :  { %v89_v25 = vpop.eup %88 }
  0x27   :  { %v91_v27 = vpop.eup %90  ;;  %v55_v28 = vadd.f32 1.0, %v89_v25 }
  0x28   :  { %v93_v30 = vpop.eup %92  ;;  %v56_v31 = vadd.f32 1.0, %v91_v27 }
  0x29   :  { %v95_v33 = vpop.eup %94  ;;  %v59_v34 = vmul.f32 %v55_v28, %v47_v24  ;;  %v57_v35 = vadd.f32 1.0, %v93_v30 }
  0x2a   :  { %v60_v36 = vmul.f32 %v56_v31, %v48_v26  ;;  %v58_v37 = vadd.f32 1.0, %v95_v33 }
  0x2b   :  { %63 = vst [vmem:[#allocation5] sm:$0xff] %v59_v34  ;;  %v61_v38 = vmul.f32 %v57_v35, %v49_v29 }
  0x2c   :  { %64 = vst [vmem:[#allocation5 + $0x8] sm:$0xff] %v60_v36  ;;  %v62_v39 = vmul.f32 %v58_v37, %v50_v32 }
  0x2d   :  { %65 = vst [vmem:[#allocation5 + $0x10] sm:$0xff] %v61_v38 }
  0x2e   :  { %66 = vst [vmem:[#allocation5 + $0x18] sm:$0xff] %v62_v39 }
  0x2f   :  { %127 = shalt.err (!%p124_p9)
}
  0x30   :  { %78 = dma.vmem_to_hbm [thread:$0]  %s73_s13, 512, %s167_s1, [#allocation4], %s141_s9, %s141_s9, %s142_s10  }
  0x31   :  { %138 = dma.done.wait [#allocation4], 512  }
  0x32   :  { %139 = vsyncadd [#allocation4], 4294966784 }
  0x33   :  { %82 = vsyncpa [#allocation3], 1 }
  0x34   :  { %83 = vsyncpa [#allocation4], 1 }

</bundles_post_ra>
